<compile_context>
chip_gen: v7x
topology: tpu7x:2x2x1
jax: 0.10.0
libtpu: 0.0.40
codegen_flags: <defaults>
</compile_context>

<pallas_src>
import functools

import jax
import jax.numpy as jnp
from jax.experimental import pallas as pl
from jax.experimental.pallas import tpu as pltpu

HIDDEN = 128        # hidden_num_2 in the PyTorch module
MAX_TILE_B = 1024   # batch-tile size for large batches (h tile = 512 KiB f32)


def _mlp_kernel(x_ref, w1_ref, b1_ref, w2_ref, b2_ref, o_ref):
    # x:  (TB, 1)
    # w1: (1, HIDDEN), b1: (1, HIDDEN)
    # w2: (1, HIDDEN)  (fc2 weight row), b2: (1, 1)
    x = x_ref[...]                       # (TB, 1)
    w1 = w1_ref[...]                     # (1, HIDDEN)
    b1 = b1_ref[...]                     # (1, HIDDEN)
    w2 = w2_ref[...]                     # (1, HIDDEN)

    # Layer 1: K=1 contraction == broadcast multiply (pure VPU, no MXU).
    h = x * w1 + b1                      # (TB, HIDDEN)
    h = jnp.maximum(h, 0.0)              # ReLU (F.relu in the spec)

    # Layer 2: N=1 matmul == lane reduction (VPU mul + XLU reduce, no MXU).
    y = jnp.sum(h * w2, axis=-1, keepdims=True) + b2_ref[...]   # (TB, 1)
    o_ref[...] = y.astype(o_ref.dtype)


@functools.partial(jax.jit, static_argnames=())
def threshold_model_forward(x, w1, b1, w2, b2):
    """x: (B, 1) float32 -> (B, 1) float32 (== fc2(relu(fc1(x))))."""
    B = x.shape[0]

    # fc2 weight presented as a single lane-dense row; bias as (1, 1).
    w2_row = w2.reshape(1, HIDDEN)
    b2_11 = b2.reshape(1, 1)

    # Pick a batch tile: large batches -> TB=MAX_TILE_B; small batches ->
    # one grid step with B rounded up to the f32 sublane tile (8).
    if B >= MAX_TILE_B:
        tb = MAX_TILE_B
        pad_b = pl.cdiv(B, tb) * tb
    else:
        pad_b = max(8, ((B + 7) // 8) * 8)
        tb = pad_b
    if pad_b != B:
        x = jnp.pad(x, ((0, pad_b - B), (0, 0)))

    grid = (pad_b // tb,)

    out = pl.pallas_call(
        _mlp_kernel,
        out_shape=jax.ShapeDtypeStruct((pad_b, 1), jnp.float32),
        grid=grid,
        in_specs=[
            pl.BlockSpec((tb, 1), lambda i: (i, 0)),          # x tile
            pl.BlockSpec((1, HIDDEN), lambda i: (0, 0)),      # w1 (resident)
            pl.BlockSpec((1, HIDDEN), lambda i: (0, 0)),      # b1 (resident)
            pl.BlockSpec((1, HIDDEN), lambda i: (0, 0)),      # w2 row (resident)
            pl.BlockSpec((1, 1), lambda i: (0, 0)),           # b2 (resident)
        ],
        out_specs=pl.BlockSpec((tb, 1), lambda i: (i, 0)),
        compiler_params=pltpu.CompilerParams(
            # Batch tiles are independent -> shard across v7x's 2 TCs
            # (no-op on single-TC v5e/v6e).
            dimension_semantics=("parallel",),
        ),
        cost_estimate=pl.CostEstimate(
            flops=4 * pad_b * HIDDEN,
            transcendentals=0,
            bytes_accessed=4 * (2 * pad_b + 3 * HIDDEN + 1),
        ),
    )(x, w1, b1, w2_row, b2_11)

    return out[:B]


def init_params(key):
    """Deterministic init mimicking PyTorch Linear default
    (uniform(-1/sqrt(fan_in), 1/sqrt(fan_in)))."""
    k1, k2, k3, k4 = jax.random.split(key, 4)
    # fc1: Linear(1 -> HIDDEN); fan_in = 1
    bound1 = 1.0
    w1 = jax.random.uniform(k1, (1, HIDDEN), jnp.float32, -bound1, bound1)
    b1 = jax.random.uniform(k2, (1, HIDDEN), jnp.float32, -bound1, bound1)
    # fc2: Linear(HIDDEN -> 1); fan_in = HIDDEN
    bound2 = 1.0 / (HIDDEN ** 0.5)
    w2 = jax.random.uniform(k3, (HIDDEN, 1), jnp.float32, -bound2, bound2)
    b2 = jax.random.uniform(k4, (1, 1), jnp.float32, -bound2, bound2)
    return w1, b1, w2, b2


def reference_forward(x, w1, b1, w2, b2):
    h = jnp.maximum(x @ w1 + b1, 0.0)
    return h @ w2 + b2


if __name__ == "__main__":
    key = jax.random.PRNGKey(0)
    kp, kx1, kx2 = jax.random.split(key, 3)
    w1, b1, w2, b2 = init_params(kp)

    # Small batch (single grid step, pad 8 -> 8).
    B_small = 8
    x_small = jax.random.normal(kx1, (B_small, 1), jnp.float32)
    out_small = jax.block_until_ready(
        threshold_model_forward(x_small, w1, b1, w2, b2))
    ref_small = reference_forward(x_small, w1, b1, w2, b2)
    assert out_small.shape == (B_small, 1)
    assert jnp.allclose(out_small, ref_small, atol=1e-5, rtol=1e-5)

    # Larger batch exercising the batch grid + padding path.
    B_big = 2052
    x_big = jax.random.normal(kx2, (B_big, 1), jnp.float32)
    out_big = jax.block_until_ready(
        threshold_model_forward(x_big, w1, b1, w2, b2))
    ref_big = reference_forward(x_big, w1, b1, w2, b2)
    assert out_big.shape == (B_big, 1)
    assert jnp.allclose(out_big, ref_big, atol=1e-5, rtol=1e-5)

    print("KERNEL_OK")
</pallas_src>

<mosaic_0001>
module attributes {stable_mosaic.version = 11 : i64} {
  func.func @_mlp_kernel(%arg0: i32, %arg1: memref<8x1xf32, #tpu.memory_space<vmem>>, %arg2: memref<1x128xf32, #tpu.memory_space<vmem>>, %arg3: memref<1x128xf32, #tpu.memory_space<vmem>>, %arg4: memref<1x128xf32, #tpu.memory_space<vmem>>, %arg5: memref<1x1xf32, #tpu.memory_space<vmem>>, %arg6: memref<8x1xf32, #tpu.memory_space<vmem>>) attributes {dimension_semantics = [#tpu.dimension_semantics<parallel>], iteration_bounds = array<i64: 1>, scalar_prefetch = 0 : i64, scratch_operands = 0 : i64, tpu.core_type = #tpu.core_type<tc>, window_params = [{transform_indices = @transform_0, window_bounds = array<i64: 8, 1>}, {pipeline_mode = #tpu.pipeline_mode<synchronous>, transform_indices = @transform_1, window_bounds = array<i64: 1, 128>}, {pipeline_mode = #tpu.pipeline_mode<synchronous>, transform_indices = @transform_2, window_bounds = array<i64: 1, 128>}, {pipeline_mode = #tpu.pipeline_mode<synchronous>, transform_indices = @transform_3, window_bounds = array<i64: 1, 128>}, {pipeline_mode = #tpu.pipeline_mode<synchronous>, transform_indices = @transform_4, window_bounds = array<i64: 1, 1>}, {transform_indices = @transform_5, window_bounds = array<i64: 8, 1>}]} {
    %c0 = arith.constant 0 : index
    %c0_0 = arith.constant 0 : index
    %0 = vector.load %arg1[%c0, %c0_0] : memref<8x1xf32, #tpu.memory_space<vmem>>, vector<8x1xf32>
    %c0_1 = arith.constant 0 : index
    %c0_2 = arith.constant 0 : index
    %1 = vector.load %arg2[%c0_1, %c0_2] : memref<1x128xf32, #tpu.memory_space<vmem>>, vector<1x128xf32>
    %c0_3 = arith.constant 0 : index
    %c0_4 = arith.constant 0 : index
    %2 = vector.load %arg3[%c0_3, %c0_4] : memref<1x128xf32, #tpu.memory_space<vmem>>, vector<1x128xf32>
    %c0_5 = arith.constant 0 : index
    %c0_6 = arith.constant 0 : index
    %3 = vector.load %arg4[%c0_5, %c0_6] : memref<1x128xf32, #tpu.memory_space<vmem>>, vector<1x128xf32>
    %4 = vector.broadcast %0 : vector<8x1xf32> to vector<8x128xf32>
    %5 = vector.broadcast %1 : vector<1x128xf32> to vector<8x128xf32>
    %6 = arith.mulf %4, %5 : vector<8x128xf32>
    %7 = vector.broadcast %2 : vector<1x128xf32> to vector<8x128xf32>
    %8 = arith.addf %6, %7 : vector<8x128xf32>
    %cst = arith.constant 0.000000e+00 : f32
    %9 = vector.broadcast %cst : f32 to vector<8x128xf32>
    %10 = arith.maximumf %8, %9 : vector<8x128xf32>
    %11 = vector.broadcast %3 : vector<1x128xf32> to vector<8x128xf32>
    %12 = arith.mulf %10, %11 : vector<8x128xf32>
    %cst_7 = arith.constant dense<0.000000e+00> : vector<8xf32>
    %13 = vector.multi_reduction <add>, %12, %cst_7 [1] : vector<8x128xf32> to vector<8xf32>
    %14 = vector.shape_cast %13 : vector<8xf32> to vector<8x1xf32>
    %c0_8 = arith.constant 0 : index
    %c0_9 = arith.constant 0 : index
    %15 = vector.load %arg5[%c0_8, %c0_9] : memref<1x1xf32, #tpu.memory_space<vmem>>, vector<1x1xf32>
    %16 = vector.broadcast %15 : vector<1x1xf32> to vector<8x1xf32>
    %17 = arith.addf %14, %16 : vector<8x1xf32>
    %c0_10 = arith.constant 0 : index
    %c0_11 = arith.constant 0 : index
    %18 = vector.load %arg6[%c0_10, %c0_11] : memref<8x1xf32, #tpu.memory_space<vmem>>, vector<8x1xf32>
    tpu.vector_store %arg6[%c0_10, %c0_11], %17 {strides = array<i32>} : memref<8x1xf32, #tpu.memory_space<vmem>>, vector<8x1xf32>,
    return
  }
  func.func @transform_0(%arg0: i32) -> (i32, i32) {
    %c0_i32 = arith.constant 0 : i32
    %c0_i32_0 = arith.constant 0 : i32
    return %arg0, %c0_i32 : i32, i32
  }
  func.func @transform_1(%arg0: i32) -> (i32, i32) {
    %c0_i32 = arith.constant 0 : i32
    %c0_i32_0 = arith.constant 0 : i32
    %c0_i32_1 = arith.constant 0 : i32
    return %c0_i32, %c0_i32_0 : i32, i32
  }
  func.func @transform_2(%arg0: i32) -> (i32, i32) {
    %c0_i32 = arith.constant 0 : i32
    %c0_i32_0 = arith.constant 0 : i32
    %c0_i32_1 = arith.constant 0 : i32
    return %c0_i32, %c0_i32_0 : i32, i32
  }
  func.func @transform_3(%arg0: i32) -> (i32, i32) {
    %c0_i32 = arith.constant 0 : i32
    %c0_i32_0 = arith.constant 0 : i32
    %c0_i32_1 = arith.constant 0 : i32
    return %c0_i32, %c0_i32_0 : i32, i32
  }
  func.func @transform_4(%arg0: i32) -> (i32, i32) {
    %c0_i32 = arith.constant 0 : i32
    %c0_i32_0 = arith.constant 0 : i32
    %c0_i32_1 = arith.constant 0 : i32
    return %c0_i32, %c0_i32_0 : i32, i32
  }
  func.func @transform_5(%arg0: i32) -> (i32, i32) {
    %c0_i32 = arith.constant 0 : i32
    %c0_i32_0 = arith.constant 0 : i32
    return %arg0, %c0_i32 : i32, i32
  }
}

</mosaic_0001>

<bundles_post_ra>
// kernel: threshold_model_forward.1
= control target key start
LH: loop header
LB: loop body
LE: loop exit
PB: predicated region body
PF: predicated region fallthrough
CT: control target
= control target key end

     0   :  { %v75_v0 = vmov 0   ;;  %vm63_vm0 = vcmask 7168   ;;  %s124_s0 = inlined_call_operand.vmem [shape: f32[8,1], index: 0, kind: input, shape index: {}]   ;;  %s125_s4 = inlined_call_operand.<no memory space> [shape: f32[1,1], index: 4, kind: input, shape index: {}]   ;;  %s126_s1 = inlined_call_operand.vmem [shape: f32[1,128], index: 1, kind: input, shape index: {}]   ;;  %s127_s2 = inlined_call_operand.vmem [shape: f32[1,128], index: 2, kind: input, shape index: {}]   ;;  %s128_s3 = inlined_call_operand.vmem [shape: f32[1,128], index: 3, kind: input, shape index: {}]   ;;  %s129_s5 = inlined_call_operand.vmem [shape: f32[8,1], index: 5, kind: output, shape index: {}]  }
   0x1   :  { %74 = vset.pattern.permute.xlu0 %v75_v0  ;;  %v22_v1 = vld [vmem:[%s124_s0] sm:$0xff]  ;;  %v10_v2 = vstv %s125_s4 }
   0x2   :  { %28 = vperm.xlu0 %74, %v22_v1   ;;  %11 = vst [vmem:[#allocation2] sm:$0x1] %v10_v2  ;;  %v69_v3 = vld [vmem:[%s126_s1] ss:$0 sm:$0xff] }
   0x3   :  { %v70_v4 = vld [vmem:[%s127_s2] ss:$0 sm:$0xff] }
   0x4   :  { %v71_v8 = vld [vmem:[%s128_s3] ss:$0 sm:$0xff] }
   0x9   :  { %v72_v11 = vld [vmem:[#allocation2] ss:$0 sm:$0xff] }
  0x81   :  { %v29_v5 = vpop.permute.xlu0 %28 }
  0x82   :  { %v37_v6 = vmul.f32 %v69_v3, %v29_v5 }
  0x84   :  { %v44_v7 = vadd.f32 %v70_v4, %v37_v6 }
  0x86   :  { %v45_v9 = vmax.f32 %v44_v7, 0.0 }
  0x88   :  { %v52_v10 = vmul.f32 %v71_v8, %v45_v9 }
  0x8a   :  { %53 = vadd.xlane.f32.xlu0 %v52_v10 }
 0x117   :  { %v54_v12 = vpop.xlane.xlu0 %53 }
 0x118   :  { %v62_v13 = vadd.f32 %v72_v11, %v54_v12 }
 0x11a   :  { %64 = vst.msk [vmem:[%s129_s5] sm:$0xff] %vm63_vm0, %v62_v13 }

</bundles_post_ra>
